<compile_context>
chip_gen: v7x
topology: tpu7x:2x2x1
jax: 0.10.0
libtpu: 0.0.40
codegen_flags: <defaults>
</compile_context>

<pallas_src>
import functools

import jax
import jax.numpy as jnp
from jax import lax
from jax.experimental import pallas as pl
from jax.experimental.pallas import tpu as pltpu

_HIDDEN_DIMS = (64, 32, 16, 8, 4, 2)


def _round_up(x, m):
    return ((x + m - 1) // m) * m


def census_mlp_kernel(x_ref, w_ref, b_ref, out_ref, *, feat, chunk, n_chunks):
    """Six fused Linear layers for one batch tile.

    x_ref   : (tb, feat)           native dtype, streamed per grid step
    w_ref   : (feat + 128, 64)     f32 packed weight slab, VMEM-resident
    b_ref   : (8, 64)              f32 packed bias slab,  VMEM-resident
    out_ref : (tb, 2)              f32
    """
    dims = (feat, *_HIDDEN_DIMS)

    # Slice each layer's weight / bias out of the packed slabs once per grid
    # step; weights are cast to bf16 once and reused by every row chunk.
    ws, bs = [], []
    row = 0
    for i in range(6):
        in_d, out_d = dims[i], dims[i + 1]
        ws.append(w_ref[row:row + in_d, 0:out_d].astype(jnp.bfloat16))
        bs.append(b_ref[i:i + 1, 0:out_d])          # f32, broadcasts over rows
        row += _round_up(in_d, 8)

    def process_chunk(c, carry):
        r0 = pl.multiple_of(c * chunk, chunk)
        h = x_ref[pl.ds(r0, chunk), :]
        for i in range(6):
            # Single-pass bf16 MXU matmul with f32 accumulation; bias add and
            # ReLU stay f32 on the VPU.
            h = jnp.dot(h.astype(jnp.bfloat16), ws[i],
                        preferred_element_type=jnp.float32) + bs[i]
            if i < 5:
                h = jnp.maximum(h, 0.0)
        out_ref[pl.ds(r0, chunk), :] = h.astype(out_ref.dtype)
        return carry

    lax.fori_loop(0, n_chunks, process_chunk, 0, unroll=True)


def _pack_params(params, feat_pad):
    """Pack six (W, b) pairs into one weight slab and one bias slab.

    Weight slab rows: [W1 (feat_pad), W2 (64), W3 (32), W4 (16), W5 (8),
    W6 (4 padded to 8)] -> (feat_pad + 128, 64) f32, zero-padded.
    Bias slab: (8, 64) f32, row i = bias of layer i (zero-padded columns).
    """
    w_blocks, b_rows = [], []
    for w, b in params:
        in_d, out_d = w.shape
        in_pad = _round_up(in_d, 8)
        wp = jnp.zeros((in_pad, 64), jnp.float32)
        wp = wp.at[:in_d, :out_d].set(w.astype(jnp.float32))
        w_blocks.append(wp)
        bp = jnp.zeros((1, 64), jnp.float32)
        bp = bp.at[:, :out_d].set(b.reshape(1, -1).astype(jnp.float32))
        b_rows.append(bp)
    wpack = jnp.concatenate(w_blocks, axis=0)
    bpack = jnp.concatenate(b_rows + [jnp.zeros((2, 64), jnp.float32)], axis=0)
    return wpack, bpack


def init_params(num_of_features, key):
    """Mirror nn.Linear's U(-1/sqrt(fan_in), 1/sqrt(fan_in)) init.

    Weights stored transposed relative to torch: (in, out). Biases (1, out).
    """
    dims = [num_of_features, *_HIDDEN_DIMS]
    params = []
    for i in range(len(dims) - 1):
        fan_in, fan_out = dims[i], dims[i + 1]
        key, kw, kb = jax.random.split(key, 3)
        bound = 1.0 / jnp.sqrt(jnp.float32(fan_in))
        w = jax.random.uniform(
            kw, (fan_in, fan_out), jnp.float32, minval=-bound, maxval=bound
        )
        b = jax.random.uniform(
            kb, (1, fan_out), jnp.float32, minval=-bound, maxval=bound
        )
        params.append((w, b))
    return params


@functools.partial(jax.jit, static_argnames=("block_b",))
def census_net_forward(x, params, *, block_b=1024):
    # torch.flatten(x, 1) equivalent (glue, outside the kernel). Keep native
    # dtype: the bf16 cast happens inside the kernel.
    batch = x.shape[0]
    x2d = x.reshape(batch, -1)
    feat = x2d.shape[1]

    # Pad the feature dim to a multiple of 8 so every weight block in the
    # packed slab starts on a sublane-aligned row.  Pad columns of x and the
    # matching W1 rows are zero, so the matmul is exact.
    feat_pad = _round_up(feat, 8)
    if feat_pad != feat:
        x2d = jnp.pad(x2d, ((0, 0), (0, feat_pad - feat)))

    # Batch tile: multiple of 32 rows (legal sublane tiling for f32/bf16/int8
    # inputs); tiles above 256 rows are rounded to a multiple of the 256-row
    # in-kernel chunk so the unrolled chunk loop stays short and uniform.
    tb = _round_up(min(block_b, _round_up(batch, 32)), 32)
    if tb > 256:
        tb = _round_up(tb, 256)
    chunk = min(256, tb)
    n_chunks = tb // chunk

    b_pad = _round_up(batch, tb)
    if b_pad != batch:
        # Zero-pad tail rows; they are discarded after the kernel.
        x2d = jnp.pad(x2d, ((0, b_pad - batch), (0, 0)))

    wpack, bpack = _pack_params(params, feat_pad)

    grid = (b_pad // tb,)
    in_specs = [
        pl.BlockSpec((tb, feat_pad), lambda i: (i, 0)),
        # Full-shape blocks, constant index_map -> parameter slabs stay
        # VMEM-resident across every grid step.
        pl.BlockSpec(wpack.shape, lambda i: (0, 0)),
        pl.BlockSpec(bpack.shape, lambda i: (0, 0)),
    ]
    out_specs = pl.BlockSpec((tb, 2), lambda i: (i, 0))

    # Advisory cost estimate.  With small F this call is MXU / per-step
    # overhead bound, not HBM-bound: per-tile DMA is tens of KB while the
    # (lane/K-padded) matmul chain dominates.  Accurate flops let XLA overlap
    # neighboring HBM-heavy ops with this compute-heavy custom call.
    dims = [feat, *_HIDDEN_DIMS]
    flops = 2 * b_pad * sum(dims[i] * dims[i + 1] for i in range(len(dims) - 1))
    bytes_accessed = (
        b_pad * feat_pad * x2d.dtype.itemsize
        + b_pad * 2 * 4
        + int(wpack.size) * 4
        + int(bpack.size) * 4
    )

    kernel = functools.partial(
        census_mlp_kernel, feat=feat_pad, chunk=chunk, n_chunks=n_chunks
    )

    out = pl.pallas_call(
        kernel,
        out_shape=jax.ShapeDtypeStruct((b_pad, 2), jnp.float32),
        grid=grid,
        in_specs=in_specs,
        out_specs=out_specs,
        compiler_params=pltpu.CompilerParams(
            # Batch steps are independent -> shard across both v7x
            # TensorCores when the grid has >= 2 steps; harmless on v5e/v6e.
            dimension_semantics=("parallel",),
            vmem_limit_bytes=32 * 1024 * 1024,
        ),
        cost_estimate=pl.CostEstimate(
            flops=flops, transcendentals=0, bytes_accessed=bytes_accessed
        ),
    )(x2d, wpack, bpack)

    return out[:batch]


def reference_forward(x, params):
    """Pure-JAX reference emulating the kernel's bf16-matmul / f32-accumulate
    arithmetic (so the correctness check stays tight)."""
    h = x.reshape(x.shape[0], -1).astype(jnp.float32)
    for i, (w, b) in enumerate(params):
        h = jnp.dot(h.astype(jnp.bfloat16), w.astype(jnp.bfloat16),
                    preferred_element_type=jnp.float32) + b.reshape(1, -1)
        if i < len(params) - 1:
            h = jnp.maximum(h, 0.0)
    return h


if __name__ == "__main__":
    num_of_features = 16

    key = jax.random.PRNGKey(0)
    key, kx1, kx2, kx3 = jax.random.split(key, 4)
    params = init_params(num_of_features, key)

    # Case 1: tiny aligned batch -> single tile, single chunk.
    x1 = jax.random.normal(kx1, (8, num_of_features), jnp.float32)
    out1 = jax.block_until_ready(census_net_forward(x1, params))
    ref1 = reference_forward(x1, params)
    assert out1.shape == (8, 2), out1.shape
    assert jnp.allclose(out1, ref1, atol=1e-3, rtol=1e-3), (
        float(jnp.max(jnp.abs(out1 - ref1)))
    )

    # Case 2: batch not divisible by the tile -> padding + a multi-step
    # pipelined grid (forced small tile for the test).
    x2 = jax.random.normal(kx2, (300, num_of_features), jnp.float32)
    out2 = jax.block_until_ready(census_net_forward(x2, params, block_b=128))
    ref2 = reference_forward(x2, params)
    assert out2.shape == (300, 2), out2.shape
    assert jnp.allclose(out2, ref2, atol=1e-3, rtol=1e-3), (
        float(jnp.max(jnp.abs(out2 - ref2)))
    )

    # Case 3: larger batch with the default tile -> exercises the in-kernel
    # multi-chunk (fori_loop) path.
    x3 = jax.random.normal(kx3, (600, num_of_features), jnp.float32)
    out3 = jax.block_until_ready(census_net_forward(x3, params))
    ref3 = reference_forward(x3, params)
    assert out3.shape == (600, 2), out3.shape
    assert jnp.allclose(out3, ref3, atol=1e-3, rtol=1e-3), (
        float(jnp.max(jnp.abs(out3 - ref3)))
    )

    print("KERNEL_OK")
</pallas_src>

<mosaic_0001>
module attributes {stable_mosaic.version = 11 : i64} {
  func.func @census_mlp_kernel(%arg0: i32, %arg1: memref<32x16xf32, #tpu.memory_space<vmem>>, %arg2: memref<144x64xf32, #tpu.memory_space<vmem>>, %arg3: memref<8x64xf32, #tpu.memory_space<vmem>>, %arg4: memref<32x2xf32, #tpu.memory_space<vmem>>) attributes {dimension_semantics = [#tpu.dimension_semantics<parallel>], iteration_bounds = array<i64: 1>, scalar_prefetch = 0 : i64, scratch_operands = 0 : i64, tpu.core_type = #tpu.core_type<tc>, window_params = [{transform_indices = @transform_0, window_bounds = array<i64: 32, 16>}, {pipeline_mode = #tpu.pipeline_mode<synchronous>, transform_indices = @transform_1, window_bounds = array<i64: 144, 64>}, {pipeline_mode = #tpu.pipeline_mode<synchronous>, transform_indices = @transform_2, window_bounds = array<i64: 8, 64>}, {transform_indices = @transform_3, window_bounds = array<i64: 32, 2>}]} {
    %c0 = arith.constant 0 : index
    %c0_0 = arith.constant 0 : index
    %0 = vector.load %arg2[%c0, %c0_0] : memref<144x64xf32, #tpu.memory_space<vmem>>, vector<16x64xf32>
    %1 = arith.truncf %0 : vector<16x64xf32> to vector<16x64xbf16>
    %c0_1 = arith.constant 0 : index
    %c0_2 = arith.constant 0 : index
    %2 = vector.load %arg3[%c0_1, %c0_2] : memref<8x64xf32, #tpu.memory_space<vmem>>, vector<1x64xf32>
    %c16 = arith.constant 16 : index
    %c0_3 = arith.constant 0 : index
    %3 = vector.load %arg2[%c16, %c0_3] : memref<144x64xf32, #tpu.memory_space<vmem>>, vector<64x32xf32>
    %4 = arith.truncf %3 : vector<64x32xf32> to vector<64x32xbf16>
    %c1 = arith.constant 1 : index
    %c0_4 = arith.constant 0 : index
    %5 = vector.load %arg3[%c1, %c0_4] : memref<8x64xf32, #tpu.memory_space<vmem>>, vector<1x32xf32>
    %c80 = arith.constant 80 : index
    %c0_5 = arith.constant 0 : index
    %6 = vector.load %arg2[%c80, %c0_5] : memref<144x64xf32, #tpu.memory_space<vmem>>, vector<32x16xf32>
    %7 = arith.truncf %6 : vector<32x16xf32> to vector<32x16xbf16>
    %c2 = arith.constant 2 : index
    %c0_6 = arith.constant 0 : index
    %8 = vector.load %arg3[%c2, %c0_6] : memref<8x64xf32, #tpu.memory_space<vmem>>, vector<1x16xf32>
    %c112 = arith.constant 112 : index
    %c0_7 = arith.constant 0 : index
    %9 = vector.load %arg2[%c112, %c0_7] : memref<144x64xf32, #tpu.memory_space<vmem>>, vector<16x8xf32>
    %10 = arith.truncf %9 : vector<16x8xf32> to vector<16x8xbf16>
    %c3 = arith.constant 3 : index
    %c0_8 = arith.constant 0 : index
    %11 = vector.load %arg3[%c3, %c0_8] : memref<8x64xf32, #tpu.memory_space<vmem>>, vector<1x8xf32>
    %c128 = arith.constant 128 : index
    %c0_9 = arith.constant 0 : index
    %12 = vector.load %arg2[%c128, %c0_9] : memref<144x64xf32, #tpu.memory_space<vmem>>, vector<8x4xf32>
    %13 = arith.truncf %12 : vector<8x4xf32> to vector<8x4xbf16>
    %c4 = arith.constant 4 : index
    %c0_10 = arith.constant 0 : index
    %14 = vector.load %arg3[%c4, %c0_10] : memref<8x64xf32, #tpu.memory_space<vmem>>, vector<1x4xf32>
    %c136 = arith.constant 136 : index
    %c0_11 = arith.constant 0 : index
    %15 = vector.load %arg2[%c136, %c0_11] : memref<144x64xf32, #tpu.memory_space<vmem>>, vector<4x2xf32>
    %16 = arith.truncf %15 : vector<4x2xf32> to vector<4x2xbf16>
    %c5 = arith.constant 5 : index
    %c0_12 = arith.constant 0 : index
    %17 = vector.load %arg3[%c5, %c0_12] : memref<8x64xf32, #tpu.memory_space<vmem>>, vector<1x2xf32>
    %c0_i32 = arith.constant 0 : i32
    %c32_i32 = arith.constant 32 : i32
    %18 = arith.muli %c0_i32, %c32_i32 : i32
    %19 = tpu.assume_multiple %18, 32 : i32
    %20 = arith.index_cast %19 : i32 to index
    %c0_13 = arith.constant 0 : index
    %21 = vector.load %arg1[%20, %c0_13] : memref<32x16xf32, #tpu.memory_space<vmem>>, vector<32x16xf32>
    %22 = arith.truncf %21 : vector<32x16xf32> to vector<32x16xbf16>
    %cst = arith.constant dense<0.000000e+00> : vector<32x64xf32>
    %23 = tpu.matmul %22, %1, %cst {dimension_numbers = #tpu.dot_dimension_numbers<[1], [0], [0], [1], [0, 0, 1, 1], [], []>} : vector<32x16xbf16>, vector<16x64xbf16>, vector<32x64xf32> -> vector<32x64xf32>
    %24 = vector.broadcast %2 : vector<1x64xf32> to vector<32x64xf32>
    %25 = arith.addf %23, %24 : vector<32x64xf32>
    %cst_14 = arith.constant 0.000000e+00 : f32
    %26 = vector.broadcast %cst_14 : f32 to vector<32x64xf32>
    %27 = arith.maximumf %25, %26 : vector<32x64xf32>
    %28 = arith.truncf %27 : vector<32x64xf32> to vector<32x64xbf16>
    %cst_15 = arith.constant dense<0.000000e+00> : vector<32x32xf32>
    %29 = tpu.matmul %28, %4, %cst_15 {dimension_numbers = #tpu.dot_dimension_numbers<[1], [0], [0], [1], [0, 0, 1, 1], [], []>} : vector<32x64xbf16>, vector<64x32xbf16>, vector<32x32xf32> -> vector<32x32xf32>
    %30 = vector.broadcast %5 : vector<1x32xf32> to vector<32x32xf32>
    %31 = arith.addf %29, %30 : vector<32x32xf32>
    %cst_16 = arith.constant 0.000000e+00 : f32
    %32 = vector.broadcast %cst_16 : f32 to vector<32x32xf32>
    %33 = arith.maximumf %31, %32 : vector<32x32xf32>
    %34 = arith.truncf %33 : vector<32x32xf32> to vector<32x32xbf16>
    %cst_17 = arith.constant dense<0.000000e+00> : vector<32x16xf32>
    %35 = tpu.matmul %34, %7, %cst_17 {dimension_numbers = #tpu.dot_dimension_numbers<[1], [0], [0], [1], [0, 0, 1, 1], [], []>} : vector<32x32xbf16>, vector<32x16xbf16>, vector<32x16xf32> -> vector<32x16xf32>
    %36 = vector.broadcast %8 : vector<1x16xf32> to vector<32x16xf32>
    %37 = arith.addf %35, %36 : vector<32x16xf32>
    %cst_18 = arith.constant 0.000000e+00 : f32
    %38 = vector.broadcast %cst_18 : f32 to vector<32x16xf32>
    %39 = arith.maximumf %37, %38 : vector<32x16xf32>
    %40 = arith.truncf %39 : vector<32x16xf32> to vector<32x16xbf16>
    %cst_19 = arith.constant dense<0.000000e+00> : vector<32x8xf32>
    %41 = tpu.matmul %40, %10, %cst_19 {dimension_numbers = #tpu.dot_dimension_numbers<[1], [0], [0], [1], [0, 0, 1, 1], [], []>} : vector<32x16xbf16>, vector<16x8xbf16>, vector<32x8xf32> -> vector<32x8xf32>
    %42 = vector.broadcast %11 : vector<1x8xf32> to vector<32x8xf32>
    %43 = arith.addf %41, %42 : vector<32x8xf32>
    %cst_20 = arith.constant 0.000000e+00 : f32
    %44 = vector.broadcast %cst_20 : f32 to vector<32x8xf32>
    %45 = arith.maximumf %43, %44 : vector<32x8xf32>
    %46 = arith.truncf %45 : vector<32x8xf32> to vector<32x8xbf16>
    %cst_21 = arith.constant dense<0.000000e+00> : vector<32x4xf32>
    %47 = tpu.matmul %46, %13, %cst_21 {dimension_numbers = #tpu.dot_dimension_numbers<[1], [0], [0], [1], [0, 0, 1, 1], [], []>} : vector<32x8xbf16>, vector<8x4xbf16>, vector<32x4xf32> -> vector<32x4xf32>
    %48 = vector.broadcast %14 : vector<1x4xf32> to vector<32x4xf32>
    %49 = arith.addf %47, %48 : vector<32x4xf32>
    %cst_22 = arith.constant 0.000000e+00 : f32
    %50 = vector.broadcast %cst_22 : f32 to vector<32x4xf32>
    %51 = arith.maximumf %49, %50 : vector<32x4xf32>
    %52 = arith.truncf %51 : vector<32x4xf32> to vector<32x4xbf16>
    %cst_23 = arith.constant dense<0.000000e+00> : vector<32x2xf32>
    %53 = tpu.matmul %52, %16, %cst_23 {dimension_numbers = #tpu.dot_dimension_numbers<[1], [0], [0], [1], [0, 0, 1, 1], [], []>} : vector<32x4xbf16>, vector<4x2xbf16>, vector<32x2xf32> -> vector<32x2xf32>
    %54 = vector.broadcast %17 : vector<1x2xf32> to vector<32x2xf32>
    %55 = arith.addf %53, %54 : vector<32x2xf32>
    %56 = arith.index_cast %19 : i32 to index
    %c0_24 = arith.constant 0 : index
    %57 = vector.load %arg4[%56, %c0_24] : memref<32x2xf32, #tpu.memory_space<vmem>>, vector<32x2xf32>
    tpu.vector_store %arg4[%56, %c0_24], %55 {strides = array<i32>} : memref<32x2xf32, #tpu.memory_space<vmem>>, vector<32x2xf32>,
    %c1_i32 = arith.constant 1 : i32
    return
  }
  func.func @transform_0(%arg0: i32) -> (i32, i32) {
    %c0_i32 = arith.constant 0 : i32
    %c0_i32_0 = arith.constant 0 : i32
    return %arg0, %c0_i32 : i32, i32
  }
  func.func @transform_1(%arg0: i32) -> (i32, i32) {
    %c0_i32 = arith.constant 0 : i32
    %c0_i32_0 = arith.constant 0 : i32
    %c0_i32_1 = arith.constant 0 : i32
    return %c0_i32, %c0_i32_0 : i32, i32
  }
  func.func @transform_2(%arg0: i32) -> (i32, i32) {
    %c0_i32 = arith.constant 0 : i32
    %c0_i32_0 = arith.constant 0 : i32
    %c0_i32_1 = arith.constant 0 : i32
    return %c0_i32, %c0_i32_0 : i32, i32
  }
  func.func @transform_3(%arg0: i32) -> (i32, i32) {
    %c0_i32 = arith.constant 0 : i32
    %c0_i32_0 = arith.constant 0 : i32
    return %arg0, %c0_i32 : i32, i32
  }
}

</mosaic_0001>

<bundles_post_ra>
// kernel: census_net_forward.1
= control target key start
LH: loop header
LB: loop body
LE: loop exit
PB: predicated region body
PF: predicated region fallthrough
CT: control target
= control target key end

     0   :  { %vm59_vm0 = vcmask 130048   ;;  %vm125_vm1 = vcmask 523264   ;;  %vm191_vm2 = vcmask 261120   ;;  %vm329_vm3 = vcmask 1043456   ;;  %s667_s1 = inlined_call_operand.vmem [shape: f32[144,64], index: 1, kind: input, shape index: {}]   ;;  %s668_s0 = inlined_call_operand.vmem [shape: f32[32,16], index: 0, kind: input, shape index: {}]   ;;  %s669_s2 = inlined_call_operand.vmem [shape: f32[8,64], index: 2, kind: input, shape index: {}]   ;;  %s670_s3 = inlined_call_operand.vmem [shape: f32[32,2], index: 3, kind: output, shape index: {}]  }
   0x1   :  { %v15_v0 = vld [vmem:[%s667_s1] sm:$0xff]  ;;  %v16_v1 = vld [vmem:[%s667_s1 + $0x8] sm:$0xff]  ;;  %v51_v5 = vld [vmem:[%s668_s0 + $0x10] sm:$0xff]  ;;  %vm322_vm4 = vcmask 64512   ;;  %vm399_vm5 = vcmask 1041408   ;;  %vm392_vm6 = vcmask 31744  }
   0x2   :  { %v49_v2 = vld [vmem:[%s668_s0] sm:$0xff]  ;;  %v17_v3 = vpack.c.bf16 %v16_v1, %v15_v0  ;;  %v50_v4 = vld [vmem:[%s668_s0 + $0x8] sm:$0xff]  ;;  %v52_v6 = vld [vmem:[%s668_s0 + $0x18] sm:$0xff]  ;;  %vm452_vm7 = vcmask 15360  }
   0x3   :  { %v53_v7 = vpack.c.bf16 %v50_v4, %v49_v2  ;;  %v19_v8 = vld [vmem:[%s667_s1 + $0x10] sm:$0xff]  ;;  %v20_v9 = vld [vmem:[%s667_s1 + $0x18] sm:$0xff]  ;;  %v21_v10 = vld [vmem:[%s667_s1 + $0x20] sm:$0xff]  ;;  %v54_v11 = vpack.c.bf16 %v52_v6, %v51_v5 }
   0x4   :  { %501 = vmatprep.subr.bf16.mxu0 %v17_v3  ;;  %v27_v12 = vpack.c.bf16 %v20_v9, %v19_v8  ;;  %v22_v13 = vld [vmem:[%s667_s1 + $0x28] sm:$0xff]  ;;  %v23_v15 = vld [vmem:[%s667_s1 + $0x30] sm:$0xff]  ;;  %v24_v16 = vld [vmem:[%s667_s1 + $0x38] sm:$0xff] }
   0x5   :  { %502 = vmatpush3.bf16.msra.mxu0 %v17_v3  ;;  %503 = vmatprep.mubr.msk.bf16.mxu0 %vm59_vm0, %v53_v7  ;;  %v28_v14 = vpack.c.bf16 %v22_v13, %v21_v10  ;;  %v29_v17 = vpack.c.bf16 %v24_v16, %v23_v15  ;;  %v25_v18 = vld [vmem:[%s667_s1 + $0x40] sm:$0xff]  ;;  %v26_v19 = vld [vmem:[%s667_s1 + $0x48] sm:$0xff]  ;;  %v32_v36 = vld [vmem:[%s667_s1 + $0x50] sm:$0xff] }
   0x6   :  { %507 = vmatprep.subr.bf16.mxu1 %v27_v12  ;;  %v30_v20 = vpack.c.bf16 %v26_v19, %v25_v18  ;;  %v461_v21 = vld [vmem:[%s669_s2] ss:$0 sm:$0xff]  ;;  %v33_v37 = vld [vmem:[%s667_s1 + $0x58] sm:$0xff]  ;;  %v35_v40 = vld [vmem:[%s667_s1 + $0x68] sm:$0xff] }
   0x7   :  { %508 = vmatpush3.bf16.msra.mxu1 %v27_v12  ;;  %v36_v38 = vpack.c.bf16 %v33_v37, %v32_v36  ;;  %v34_v39 = vld [vmem:[%s667_s1 + $0x60] sm:$0xff]  ;;  %v39_v57 = vld [vmem:[%s667_s1 + $0x70] sm:$0xff]  ;;  %v40_v58 = vld [vmem:[%s667_s1 + $0x78] sm:$0xff] }
   0x8   :  { %504 = vmatmul.mubr.msk.bf16.vlgmr.msra.gmra.mrb[0].mxu0 %vm59_vm0, %v54_v11  ;;  %509 = vmatprep.subr.bf16.mxu1 %v28_v14  ;;  %v37_v41 = vpack.c.bf16 %v35_v40, %v34_v39  ;;  %v464_v42 = vld [vmem:[%s669_s2 + $0x1] ss:$0 sm:$0xff]  ;;  %v41_v59 = vpack.c.bf16 %v40_v58, %v39_v57  ;;  %v467_v60 = vld [vmem:[%s669_s2 + $0x2] ss:$0 sm:$0xff] }
   0x9   :  { %519 = vmatprep.subr.bf16.mxu0 %v36_v38  ;;  %v43_v11 = vld [vmem:[%s667_s1 + $0x80] sm:$0xff] }
   0xa   :  { %520 = vmatpush3.bf16.msra.mxu0 %v36_v38  ;;  %v44_v12 = vpack.c.bf16 %v43_v11, %v43_v11 }
   0xb   :  { %510 = vmatpush3.bf16.msra.mxu1 %v28_v14  ;;  %521 = vmatprep.subr.bf16.mxu0 %v37_v41  ;;  %v470_v14 = vld [vmem:[%s669_s2 + $0x3] ss:$0 sm:$0xff] }
   0xc   :  { %511 = vmatprep.subr.bf16.mxu1 %v29_v17  ;;  %v331_v13 = vsel %vm329_vm3, %v44_v12, 0 }
   0xe   :  { %522 = vmatpush3.bf16.msra.mxu0 %v37_v41 }
   0xf   :  { %512 = vmatpush3.bf16.msra.mxu1 %v29_v17  ;;  %527 = vmatprep.subr.bf16.mxu0 %v41_v59 }
  0x10   :  { %513 = vmatprep.subr.bf16.mxu1 %v30_v20 }
  0x13   :  { %514 = vmatpush3.bf16.msra.mxu1 %v30_v20 }
  0x14   :  { %545 = vmatprep.subr.msk.bf16.mxu1 %vm329_vm3, %v44_v12 }
  0xdb   :  { %v505_v22 = vpop.f32.mrb[0].mxu0 }
  0xdc   :  { %v109_v23 = vadd.f32 %v505_v22, %v461_v21  ;;  %v100_v24 = vpop.f32.mrb[1].mxu0 }
  0xdd   :  { %v101_v25 = vadd.f32 %v461_v21, %v100_v24  ;;  %v506_v26 = vpop.f32.mrb[2].mxu0 }
  0xde   :  { %v112_v27 = vadd.f32 %v506_v26, %v461_v21  ;;  %v103_v28 = vpop.f32.mrb[3].mxu0  ;;  %v117_v30 = vmax.f32 %v109_v23, 0.0 }
  0xdf   :  { %v104_v29 = vadd.f32 %v461_v21, %v103_v28  ;;  %v115_v32 = vmax.f32 %v101_v25, 0.0 }
  0xe0   :  { %v118_v31 = vmax.f32 %v112_v27, 0.0 }
  0xe1   :  { %v116_v33 = vmax.f32 %v104_v29, 0.0  ;;  %v46_v29 = vld [vmem:[%s667_s1 + $0x88] sm:$0xf] }
  0xe2   :  { %v120_v34 = vpack.c.bf16 %v118_v31, %v117_v30  ;;  %v47_v30 = vpack.c.bf16 %v46_v29, %v46_v29 }
  0xe3   :  { %v119_v35 = vpack.c.bf16 %v116_v33, %v115_v32  ;;  %v473_v32 = vld [vmem:[%s669_s2 + $0x4] ss:$0 sm:$0xff] }
  0xe4   :  { %v401_v31 = vsel %vm399_vm5, %v47_v30, 0 }
  0xe5   :  { %515 = vmatprep.mubr.msk.bf16.mxu1 %vm125_vm1, %v119_v35 }
  0xe6   :  { %516 = vmatmul.mubr.msk.bf16.vlgmr.msra.gmra.mrb[0].mxu1 %vm125_vm1, %v120_v34 }
  0xe7   :  { %534 = vmatpush3.bf16.msra.mxu1 %v331_v13 }
 0x1b9   :  { %v517_v43 = vpop.f32.mrb[0].mxu1 }
 0x1ba   :  { %v175_v44 = vadd.f32 %v517_v43, %v464_v42  ;;  %v166_v45 = vpop.f32.mrb[1].mxu1 }
 0x1bb   :  { %v167_v46 = vadd.f32 %v464_v42, %v166_v45  ;;  %v518_v47 = vpop.f32.mrb[2].mxu1 }
 0x1bc   :  { %v178_v48 = vadd.f32 %v518_v47, %v464_v42  ;;  %v169_v49 = vpop.f32.mrb[3].mxu1  ;;  %v183_v51 = vmax.f32 %v175_v44, 0.0  ;;  %v476_v47 = vld [vmem:[%s669_s2 + $0x5] ss:$0 sm:$0xff] }
 0x1bd   :  { %v170_v50 = vadd.f32 %v464_v42, %v169_v49  ;;  %v181_v53 = vmax.f32 %v167_v46, 0.0 }
 0x1be   :  { %v184_v52 = vmax.f32 %v178_v48, 0.0 }
 0x1bf   :  { %v182_v54 = vmax.f32 %v170_v50, 0.0 }
 0x1c0   :  { %v186_v55 = vpack.c.bf16 %v184_v52, %v183_v51 }
 0x1c1   :  { %v185_v56 = vpack.c.bf16 %v182_v54, %v181_v53 }
 0x1c3   :  { %523 = vmatprep.mubr.msk.bf16.mxu0 %vm191_vm2, %v185_v56 }
 0x1c4   :  { %524 = vmatmul.mubr.msk.bf16.vlgmr.msra.gmra.mrb[4].mxu0 %vm191_vm2, %v186_v55 }
 0x1c5   :  { %528 = vmatpush3.bf16.msra.mxu0 %v41_v59 }
 0x1c6   :  { %546 = vmatprep.subr.msk.bf16.mxu0 %vm399_vm5, %v47_v30 }
 0x297   :  { %v525_v61 = vpop.f32.mrb[4].mxu0 }
 0x298   :  { %v241_v62 = vadd.f32 %v525_v61, %v467_v60  ;;  %v232_v63 = vpop.f32.mrb[5].mxu0 }
 0x299   :  { %v233_v0 = vadd.f32 %v467_v60, %v232_v63  ;;  %v526_v1 = vpop.f32.mrb[6].mxu0 }
 0x29a   :  { %v244_v2 = vadd.f32 %v526_v1, %v467_v60  ;;  %v235_v3 = vpop.f32.mrb[7].mxu0  ;;  %v249_v5 = vmax.f32 %v241_v62, 0.0 }
 0x29b   :  { %v236_v4 = vadd.f32 %v467_v60, %v235_v3  ;;  %v247_v7 = vmax.f32 %v233_v0, 0.0 }
 0x29c   :  { %v250_v6 = vmax.f32 %v244_v2, 0.0 }
 0x29d   :  { %v248_v8 = vmax.f32 %v236_v4, 0.0 }
 0x29e   :  { %v252_v9 = vpack.c.bf16 %v250_v6, %v249_v5 }
 0x29f   :  { %v251_v10 = vpack.c.bf16 %v248_v8, %v247_v7 }
 0x2a1   :  { %529 = vmatprep.mubr.msk.bf16.mxu0 %vm59_vm0, %v251_v10 }
 0x2a2   :  { %530 = vmatmul.mubr.msk.bf16.vlgmr.msra.gmra.mrb[8].mxu0 %vm59_vm0, %v252_v9 }
 0x2a3   :  { %540 = vmatpush3.bf16.msra.mxu0 %v401_v31 }
 0x375   :  { %v531_v15 = vpop.f32.mrb[8].mxu0 }
 0x376   :  { %v306_v16 = vadd.f32 %v531_v15, %v470_v14  ;;  %v297_v17 = vpop.f32.mrb[9].mxu0 }
 0x377   :  { %v298_v18 = vadd.f32 %v470_v14, %v297_v17  ;;  %v532_v19 = vpop.f32.mrb[10].mxu0 }
 0x378   :  { %v309_v20 = vadd.f32 %v532_v19, %v470_v14  ;;  %v300_v21 = vpop.f32.mrb[11].mxu0  ;;  %v314_v23 = vmax.f32 %v306_v16, 0.0 }
 0x379   :  { %v301_v22 = vadd.f32 %v470_v14, %v300_v21  ;;  %v312_v25 = vmax.f32 %v298_v18, 0.0 }
 0x37a   :  { %v315_v24 = vmax.f32 %v309_v20, 0.0 }
 0x37b   :  { %v313_v26 = vmax.f32 %v301_v22, 0.0 }
 0x37c   :  { %v317_v27 = vpack.c.bf16 %v315_v24, %v314_v23 }
 0x37d   :  { %v316_v28 = vpack.c.bf16 %v313_v26, %v312_v25 }
 0x37f   :  { %535 = vmatprep.mubr.msk.bf16.mxu1 %vm322_vm4, %v316_v28 }
 0x380   :  { %536 = vmatmul.mubr.msk.bf16.vlgmr.msra.gmra.mrb[4].mxu1 %vm322_vm4, %v317_v27 }
 0x453   :  { %v537_v33 = vpop.f32.mrb[4].mxu1 }
 0x454   :  { %v376_v34 = vadd.f32 %v537_v33, %v473_v32  ;;  %v367_v35 = vpop.f32.mrb[5].mxu1 }
 0x455   :  { %v368_v36 = vadd.f32 %v473_v32, %v367_v35  ;;  %v538_v37 = vpop.f32.mrb[6].mxu1 }
 0x456   :  { %v379_v38 = vadd.f32 %v538_v37, %v473_v32  ;;  %v370_v39 = vpop.f32.mrb[7].mxu1  ;;  %v384_v41 = vmax.f32 %v376_v34, 0.0 }
 0x457   :  { %v371_v40 = vadd.f32 %v473_v32, %v370_v39  ;;  %v382_v43 = vmax.f32 %v368_v36, 0.0 }
 0x458   :  { %v385_v42 = vmax.f32 %v379_v38, 0.0 }
 0x459   :  { %v383_v44 = vmax.f32 %v371_v40, 0.0 }
 0x45a   :  { %v387_v45 = vpack.c.bf16 %v385_v42, %v384_v41 }
 0x45b   :  { %v386_v46 = vpack.c.bf16 %v383_v44, %v382_v43 }
 0x45d   :  { %541 = vmatprep.mubr.msk.bf16.mxu0 %vm392_vm6, %v386_v46 }
 0x45e   :  { %542 = vmatmul.mubr.msk.bf16.vlgmr.msra.gmra.mrb[12].mxu0 %vm392_vm6, %v387_v45 }
 0x531   :  { %v543_v48 = vpop.f32.mrb[12].mxu0 }
 0x532   :  { %v446_v49 = vadd.f32 %v543_v48, %v476_v47  ;;  %v437_v50 = vpop.f32.mrb[13].mxu0 }
 0x533   :  { %v438_v51 = vadd.f32 %v476_v47, %v437_v50  ;;  %v544_v52 = vpop.f32.mrb[14].mxu0 }
 0x534   :  { %455 = vst.msk [vmem:[%s670_s3 + $0x10] sm:$0xff] %vm452_vm7, %v446_v49  ;;  %v449_v53 = vadd.f32 %v544_v52, %v476_v47  ;;  %v440_v54 = vpop.f32.mrb[15].mxu0 }
 0x535   :  { %453 = vst.msk [vmem:[%s670_s3] sm:$0xff] %vm452_vm7, %v438_v51  ;;  %v441_v55 = vadd.f32 %v476_v47, %v440_v54 }
 0x536   :  { %456 = vst.msk [vmem:[%s670_s3 + $0x18] sm:$0xff] %vm452_vm7, %v449_v53 }
 0x537   :  { %454 = vst.msk [vmem:[%s670_s3 + $0x8] sm:$0xff] %vm452_vm7, %v441_v55 }

</bundles_post_ra>
